<compile_context>
chip_gen: v6e
topology: v6e:2x2x1
jax: 0.10.0
libtpu: 0.0.40
codegen_flags: <defaults>
</compile_context>

<pallas_src>
import math

import jax
import jax.numpy as jnp
import numpy as np
from jax.experimental import pallas as pl
from jax.experimental.pallas import tpu as pltpu

KERNEL_MUL = 2
KERNEL_NUM = 5


def _mmd_kernel(src_ref, tgt_ref, out_ref,
                dss_ref, dtt_ref, dst_ref, dts_ref, sq_ref, colsq_ref):
    """Grid: 1-D over feature tiles (reduction axis).

    src_ref/tgt_ref : [B, TF] VMEM feature tiles of source / target.
    out_ref         : [1, 1]  SMEM scalar loss (written on the last tile).
    d*_ref          : [B, 1]  VMEM accumulators for the 4 distance families.
    sq_ref/colsq_ref: [1, 1]  VMEM accumulators for the analytic sum(L2).
    """
    k = pl.program_id(0)

    @pl.when(k == 0)
    def _init():
        dss_ref[...] = jnp.zeros_like(dss_ref)
        dtt_ref[...] = jnp.zeros_like(dtt_ref)
        dst_ref[...] = jnp.zeros_like(dst_ref)
        dts_ref[...] = jnp.zeros_like(dts_ref)
        sq_ref[...] = jnp.zeros_like(sq_ref)
        colsq_ref[...] = jnp.zeros_like(colsq_ref)

    s = src_ref[...].astype(jnp.float32)          # [B, TF]
    t = tgt_ref[...].astype(jnp.float32)          # [B, TF]
    b = s.shape[0]
    n = 2 * b

    # ---- analytic pieces of sum(L2) = 2N*sum_i||c_i||^2 - 2*||sum_i c_i||^2
    sq_ref[...] += jnp.sum(s * s) + jnp.sum(t * t)
    col = jnp.sum(s, axis=0, keepdims=True) + jnp.sum(t, axis=0, keepdims=True)
    colsq_ref[...] += jnp.sum(col * col)          # per-feature squares: exact under F-tiling

    # ---- only the 4*B distances selected by mode='simple' ------------------
    # Row i is paired with row (i+1) % B: a sublane rotation by B-1.
    s2 = pltpu.roll(s, shift=b - 1, axis=0)
    t2 = pltpu.roll(t, shift=b - 1, axis=0)

    def partial_sqdist(a, c):
        d = a - c
        return jnp.sum(d * d, axis=1, keepdims=True)   # [B, 1]

    dss_ref[...] += partial_sqdist(s, s2)   # K[i,        (i+1)%B      ]
    dtt_ref[...] += partial_sqdist(t, t2)   # K[B+i,      B + (i+1)%B  ]
    dst_ref[...] += partial_sqdist(s, t2)   # K[i,        B + (i+1)%B  ]
    dts_ref[...] += partial_sqdist(s2, t)   # K[(i+1)%B,  B + i        ]

    @pl.when(k == pl.num_programs(0) - 1)
    def _finalize():
        total_l2 = jnp.maximum(
            2.0 * float(n) * sq_ref[...] - 2.0 * colsq_ref[...], 0.0)   # [1,1]
        bandwidth = total_l2 / float(n * n - n)
        bandwidth = bandwidth / float(KERNEL_MUL ** (KERNEL_NUM // 2))
        bw_max = bandwidth * float(KERNEL_MUL ** (KERNEL_NUM - 1))
        neg_inv = -1.0 / bw_max                  # one reciprocal, hoisted out of the exp path

        def multi_kernel(d):                     # sum_{i=0..4} exp(-d / (bandwidth * 2^i))
            base = jnp.exp(d * neg_inv)          # exp(-d / (bandwidth * 2^4))
            b2 = base * base
            b4 = b2 * b2
            b8 = b4 * b4
            b16 = b8 * b8
            return base + b2 + b4 + b8 + b16     # 1 EUP exp + 4 VPU squarings

        contrib = (multi_kernel(dss_ref[...]) + multi_kernel(dtt_ref[...])
                   - multi_kernel(dst_ref[...]) - multi_kernel(dts_ref[...]))
        out_ref[0, 0] = jnp.sum(contrib) / float(b)


def mmd_loss(source: jax.Array, target: jax.Array) -> jax.Array:
    """source, target: [B, F]. Returns scalar MMD loss (mode='simple')."""
    assert source.shape == target.shape and source.ndim == 2
    b, f = source.shape

    # Lane-align the feature axis; zero feature-padding is semantically inert
    # (adds nothing to distances, row norms, or column sums).
    f_pad = max(128, ((f + 127) // 128) * 128)
    # Feature tile: keep (2 inputs x double buffer) comfortably inside scoped VMEM.
    max_lane = 512
    while b * max_lane * 4 * 4 > (8 << 20) and max_lane > 128:
        max_lane //= 2
    tf = math.gcd(f_pad, max_lane)               # 128 / 256 / 512, divides f_pad
    if f_pad != f:
        pad = ((0, 0), (0, f_pad - f))
        source = jnp.pad(source, pad)
        target = jnp.pad(target, pad)

    grid = (f_pad // tf,)
    out = pl.pallas_call(
        _mmd_kernel,
        out_shape=jax.ShapeDtypeStruct((1, 1), jnp.float32),
        grid=grid,
        in_specs=[
            pl.BlockSpec((b, tf), lambda k: (0, k)),
            pl.BlockSpec((b, tf), lambda k: (0, k)),
        ],
        out_specs=pl.BlockSpec((1, 1), lambda k: (0, 0),
                               memory_space=pltpu.MemorySpace.SMEM),
        scratch_shapes=[
            pltpu.VMEM((b, 1), jnp.float32),   # d_ss accumulator
            pltpu.VMEM((b, 1), jnp.float32),   # d_tt accumulator
            pltpu.VMEM((b, 1), jnp.float32),   # d_st accumulator
            pltpu.VMEM((b, 1), jnp.float32),   # d_ts accumulator
            pltpu.VMEM((1, 1), jnp.float32),   # sum_i ||c_i||^2
            pltpu.VMEM((1, 1), jnp.float32),   # sum_f (colsum_f)^2
        ],
        compiler_params=pltpu.CompilerParams(
            dimension_semantics=("arbitrary",)),   # feature axis is a reduction
    )(source, target)
    return out[0, 0]
    # TODO(synk): mode='complete' (not the module default) and a batch-tiled
    # variant for very large B (the (i+1)%B wrap couples the first/last rows
    # across B-tiles) are not implemented; many independent MMD evaluations at
    # tiny B should instead be batched over a leading "parallel" grid axis.


def _mmd_loss_reference(source, target):
    """Pure-JAX mirror of the PyTorch MMD_Loss(mode='simple') forward."""
    b = source.shape[0]
    n = 2 * b
    concat = jnp.concatenate([source, target], axis=0)
    diff = concat[None, :, :] - concat[:, None, :]
    l2 = jnp.sum(diff * diff, axis=2)
    bandwidth = jnp.sum(l2) / (n * n - n)
    bandwidth = bandwidth / (KERNEL_MUL ** (KERNEL_NUM // 2))
    kval = sum(jnp.exp(-l2 / (bandwidth * KERNEL_MUL ** i))
               for i in range(KERNEL_NUM))
    ind_s_1 = np.arange(b)
    ind_s_2 = np.concatenate([np.arange(1, b), [0]])
    ind_t_1 = np.arange(b, 2 * b)
    ind_t_2 = np.concatenate([np.arange(b + 1, 2 * b), [b]])
    loss = (kval[ind_s_1, ind_s_2] + kval[ind_t_1, ind_t_2]
            - kval[ind_s_1, ind_t_2] - kval[ind_s_2, ind_t_1])
    return jnp.sum(loss) / b


if __name__ == "__main__":
    key = jax.random.PRNGKey(0)

    # Case 1: lane-aligned features, single feature tile.
    k1, k2 = jax.random.split(key)
    batch, features = 8, 128
    source = jax.random.normal(k1, (batch, features), dtype=jnp.float32)
    target = jax.random.normal(k2, (batch, features), dtype=jnp.float32) + 0.5

    loss = jax.block_until_ready(mmd_loss(source, target))
    ref = jax.block_until_ready(_mmd_loss_reference(source, target))
    assert np.isfinite(float(loss))
    np.testing.assert_allclose(float(loss), float(ref), rtol=1e-4, atol=1e-5)

    # Case 2: unaligned feature count -> zero-padded to 384, 3-step reduction grid.
    k3, k4 = jax.random.split(k2)
    source2 = jax.random.normal(k3, (8, 320), dtype=jnp.float32)
    target2 = jax.random.normal(k4, (8, 320), dtype=jnp.float32) + 0.5

    loss2 = jax.block_until_ready(mmd_loss(source2, target2))
    ref2 = jax.block_until_ready(_mmd_loss_reference(source2, target2))
    assert np.isfinite(float(loss2))
    np.testing.assert_allclose(float(loss2), float(ref2), rtol=1e-4, atol=1e-5)

    print("KERNEL_OK")
</pallas_src>

<mosaic_0001>
module attributes {stable_mosaic.version = 11 : i64} {
  func.func @_mmd_kernel(%arg0: i32, %arg1: memref<8x128xf32, #tpu.memory_space<vmem>>, %arg2: memref<8x128xf32, #tpu.memory_space<vmem>>, %arg3: memref<1x1xf32, #tpu.memory_space<smem>>, %arg4: memref<8x1xf32, #tpu.memory_space<vmem>>, %arg5: memref<8x1xf32, #tpu.memory_space<vmem>>, %arg6: memref<8x1xf32, #tpu.memory_space<vmem>>, %arg7: memref<8x1xf32, #tpu.memory_space<vmem>>, %arg8: memref<1x1xf32, #tpu.memory_space<vmem>>, %arg9: memref<1x1xf32, #tpu.memory_space<vmem>>) attributes {dimension_semantics = [#tpu.dimension_semantics<arbitrary>], iteration_bounds = array<i64: 1>, scalar_prefetch = 0 : i64, scratch_operands = 6 : i64, tpu.core_type = #tpu.core_type<tc>, window_params = [{transform_indices = @transform_0, window_bounds = array<i64: 8, 128>}, {transform_indices = @transform_1, window_bounds = array<i64: 8, 128>}, {transform_indices = @transform_2, window_bounds = array<i64: 1, 1>}]} {
    %c0_i32 = arith.constant 0 : i32
    %0 = arith.cmpi eq, %arg0, %c0_i32 : i32
    %1 = arith.extui %0 : i1 to i32
    %c0_i32_0 = arith.constant 0 : i32
    %2 = arith.cmpi ne, %1, %c0_i32_0 : i32
    scf.if %2 {
      %cst_39 = arith.constant 0.000000e+00 : f32
      %67 = vector.broadcast %cst_39 : f32 to vector<8x1xf32>
      %c0_40 = arith.constant 0 : index
      %c0_41 = arith.constant 0 : index
      %68 = vector.load %arg4[%c0_40, %c0_41] : memref<8x1xf32, #tpu.memory_space<vmem>>, vector<8x1xf32>
      tpu.vector_store %arg4[%c0_40, %c0_41], %67 {strides = array<i32>} : memref<8x1xf32, #tpu.memory_space<vmem>>, vector<8x1xf32>,
      %cst_42 = arith.constant 0.000000e+00 : f32
      %69 = vector.broadcast %cst_42 : f32 to vector<8x1xf32>
      %c0_43 = arith.constant 0 : index
      %c0_44 = arith.constant 0 : index
      %70 = vector.load %arg5[%c0_43, %c0_44] : memref<8x1xf32, #tpu.memory_space<vmem>>, vector<8x1xf32>
      tpu.vector_store %arg5[%c0_43, %c0_44], %69 {strides = array<i32>} : memref<8x1xf32, #tpu.memory_space<vmem>>, vector<8x1xf32>,
      %cst_45 = arith.constant 0.000000e+00 : f32
      %71 = vector.broadcast %cst_45 : f32 to vector<8x1xf32>
      %c0_46 = arith.constant 0 : index
      %c0_47 = arith.constant 0 : index
      %72 = vector.load %arg6[%c0_46, %c0_47] : memref<8x1xf32, #tpu.memory_space<vmem>>, vector<8x1xf32>
      tpu.vector_store %arg6[%c0_46, %c0_47], %71 {strides = array<i32>} : memref<8x1xf32, #tpu.memory_space<vmem>>, vector<8x1xf32>,
      %cst_48 = arith.constant 0.000000e+00 : f32
      %73 = vector.broadcast %cst_48 : f32 to vector<8x1xf32>
      %c0_49 = arith.constant 0 : index
      %c0_50 = arith.constant 0 : index
      %74 = vector.load %arg7[%c0_49, %c0_50] : memref<8x1xf32, #tpu.memory_space<vmem>>, vector<8x1xf32>
      tpu.vector_store %arg7[%c0_49, %c0_50], %73 {strides = array<i32>} : memref<8x1xf32, #tpu.memory_space<vmem>>, vector<8x1xf32>,
      %cst_51 = arith.constant 0.000000e+00 : f32
      %75 = vector.broadcast %cst_51 : f32 to vector<1x1xf32>
      %c0_52 = arith.constant 0 : index
      %c0_53 = arith.constant 0 : index
      %76 = vector.load %arg8[%c0_52, %c0_53] : memref<1x1xf32, #tpu.memory_space<vmem>>, vector<1x1xf32>
      tpu.vector_store %arg8[%c0_52, %c0_53], %75 {strides = array<i32>} : memref<1x1xf32, #tpu.memory_space<vmem>>, vector<1x1xf32>,
      %cst_54 = arith.constant 0.000000e+00 : f32
      %77 = vector.broadcast %cst_54 : f32 to vector<1x1xf32>
      %c0_55 = arith.constant 0 : index
      %c0_56 = arith.constant 0 : index
      %78 = vector.load %arg9[%c0_55, %c0_56] : memref<1x1xf32, #tpu.memory_space<vmem>>, vector<1x1xf32>
      tpu.vector_store %arg9[%c0_55, %c0_56], %77 {strides = array<i32>} : memref<1x1xf32, #tpu.memory_space<vmem>>, vector<1x1xf32>,
    } else {
    }
    %c0 = arith.constant 0 : index
    %c0_1 = arith.constant 0 : index
    %3 = vector.load %arg1[%c0, %c0_1] : memref<8x128xf32, #tpu.memory_space<vmem>>, vector<8x128xf32>
    %c0_2 = arith.constant 0 : index
    %c0_3 = arith.constant 0 : index
    %4 = vector.load %arg2[%c0_2, %c0_3] : memref<8x128xf32, #tpu.memory_space<vmem>>, vector<8x128xf32>
    %c0_4 = arith.constant 0 : index
    %c0_5 = arith.constant 0 : index
    %5 = vector.load %arg8[%c0_4, %c0_5] : memref<1x1xf32, #tpu.memory_space<vmem>>, vector<1x1xf32>
    %6 = arith.mulf %3, %3 : vector<8x128xf32>
    %7 = vector.shape_cast %6 : vector<8x128xf32> to vector<1x8x128xf32>
    %cst = arith.constant dense<0.000000e+00> : vector<1xf32>
    %8 = vector.multi_reduction <add>, %7, %cst [1, 2] : vector<1x8x128xf32> to vector<1xf32>
    %9 = vector.shape_cast %8 : vector<1xf32> to vector<1x1x1xf32>
    %10 = vector.extract %9[0, 0, 0] : f32 from vector<1x1x1xf32>
    %11 = arith.mulf %4, %4 : vector<8x128xf32>
    %12 = vector.shape_cast %11 : vector<8x128xf32> to vector<1x8x128xf32>
    %cst_6 = arith.constant dense<0.000000e+00> : vector<1xf32>
    %13 = vector.multi_reduction <add>, %12, %cst_6 [1, 2] : vector<1x8x128xf32> to vector<1xf32>
    %14 = vector.shape_cast %13 : vector<1xf32> to vector<1x1x1xf32>
    %15 = vector.extract %14[0, 0, 0] : f32 from vector<1x1x1xf32>
    %16 = arith.addf %10, %15 : f32
    %17 = vector.broadcast %16 : f32 to vector<1x1xf32>
    %18 = arith.addf %5, %17 : vector<1x1xf32>
    %c0_7 = arith.constant 0 : index
    %c0_8 = arith.constant 0 : index
    %19 = vector.load %arg8[%c0_7, %c0_8] : memref<1x1xf32, #tpu.memory_space<vmem>>, vector<1x1xf32>
    tpu.vector_store %arg8[%c0_7, %c0_8], %18 {strides = array<i32>} : memref<1x1xf32, #tpu.memory_space<vmem>>, vector<1x1xf32>,
    %cst_9 = arith.constant dense<0.000000e+00> : vector<128xf32>
    %20 = vector.multi_reduction <add>, %3, %cst_9 [0] : vector<8x128xf32> to vector<128xf32>
    %21 = vector.shape_cast %20 : vector<128xf32> to vector<1x128xf32>
    %cst_10 = arith.constant dense<0.000000e+00> : vector<128xf32>
    %22 = vector.multi_reduction <add>, %4, %cst_10 [0] : vector<8x128xf32> to vector<128xf32>
    %23 = vector.shape_cast %22 : vector<128xf32> to vector<1x128xf32>
    %24 = arith.addf %21, %23 : vector<1x128xf32>
    %c0_11 = arith.constant 0 : index
    %c0_12 = arith.constant 0 : index
    %25 = vector.load %arg9[%c0_11, %c0_12] : memref<1x1xf32, #tpu.memory_space<vmem>>, vector<1x1xf32>
    %26 = arith.mulf %24, %24 : vector<1x128xf32>
    %27 = vector.shape_cast %26 : vector<1x128xf32> to vector<1x1x128xf32>
    %cst_13 = arith.constant dense<0.000000e+00> : vector<1xf32>
    %28 = vector.multi_reduction <add>, %27, %cst_13 [1, 2] : vector<1x1x128xf32> to vector<1xf32>
    %29 = vector.shape_cast %28 : vector<1xf32> to vector<1x1x1xf32>
    %30 = vector.extract %29[0, 0, 0] : f32 from vector<1x1x1xf32>
    %31 = vector.broadcast %30 : f32 to vector<1x1xf32>
    %32 = arith.addf %25, %31 : vector<1x1xf32>
    %c0_14 = arith.constant 0 : index
    %c0_15 = arith.constant 0 : index
    %33 = vector.load %arg9[%c0_14, %c0_15] : memref<1x1xf32, #tpu.memory_space<vmem>>, vector<1x1xf32>
    tpu.vector_store %arg9[%c0_14, %c0_15], %32 {strides = array<i32>} : memref<1x1xf32, #tpu.memory_space<vmem>>, vector<1x1xf32>,
    %c7_i32 = arith.constant 7 : i32
    %34 = tpu.dynamic_rotate %3 by %c7_i32 dim 0 : vector<8x128xf32>, i32 -> vector<8x128xf32>
    %c7_i32_16 = arith.constant 7 : i32
    %35 = tpu.dynamic_rotate %4 by %c7_i32_16 dim 0 : vector<8x128xf32>, i32 -> vector<8x128xf32>
    %c0_17 = arith.constant 0 : index
    %c0_18 = arith.constant 0 : index
    %36 = vector.load %arg4[%c0_17, %c0_18] : memref<8x1xf32, #tpu.memory_space<vmem>>, vector<8x1xf32>
    %37 = arith.subf %3, %34 : vector<8x128xf32>
    %38 = arith.mulf %37, %37 : vector<8x128xf32>
    %cst_19 = arith.constant dense<0.000000e+00> : vector<8xf32>
    %39 = vector.multi_reduction <add>, %38, %cst_19 [1] : vector<8x128xf32> to vector<8xf32>
    %40 = vector.shape_cast %39 : vector<8xf32> to vector<8x1xf32>
    %41 = arith.addf %36, %40 : vector<8x1xf32>
    %c0_20 = arith.constant 0 : index
    %c0_21 = arith.constant 0 : index
    %42 = vector.load %arg4[%c0_20, %c0_21] : memref<8x1xf32, #tpu.memory_space<vmem>>, vector<8x1xf32>
    tpu.vector_store %arg4[%c0_20, %c0_21], %41 {strides = array<i32>} : memref<8x1xf32, #tpu.memory_space<vmem>>, vector<8x1xf32>,
    %c0_22 = arith.constant 0 : index
    %c0_23 = arith.constant 0 : index
    %43 = vector.load %arg5[%c0_22, %c0_23] : memref<8x1xf32, #tpu.memory_space<vmem>>, vector<8x1xf32>
    %44 = arith.subf %4, %35 : vector<8x128xf32>
    %45 = arith.mulf %44, %44 : vector<8x128xf32>
    %cst_24 = arith.constant dense<0.000000e+00> : vector<8xf32>
    %46 = vector.multi_reduction <add>, %45, %cst_24 [1] : vector<8x128xf32> to vector<8xf32>
    %47 = vector.shape_cast %46 : vector<8xf32> to vector<8x1xf32>
    %48 = arith.addf %43, %47 : vector<8x1xf32>
    %c0_25 = arith.constant 0 : index
    %c0_26 = arith.constant 0 : index
    %49 = vector.load %arg5[%c0_25, %c0_26] : memref<8x1xf32, #tpu.memory_space<vmem>>, vector<8x1xf32>
    tpu.vector_store %arg5[%c0_25, %c0_26], %48 {strides = array<i32>} : memref<8x1xf32, #tpu.memory_space<vmem>>, vector<8x1xf32>,
    %c0_27 = arith.constant 0 : index
    %c0_28 = arith.constant 0 : index
    %50 = vector.load %arg6[%c0_27, %c0_28] : memref<8x1xf32, #tpu.memory_space<vmem>>, vector<8x1xf32>
    %51 = arith.subf %3, %35 : vector<8x128xf32>
    %52 = arith.mulf %51, %51 : vector<8x128xf32>
    %cst_29 = arith.constant dense<0.000000e+00> : vector<8xf32>
    %53 = vector.multi_reduction <add>, %52, %cst_29 [1] : vector<8x128xf32> to vector<8xf32>
    %54 = vector.shape_cast %53 : vector<8xf32> to vector<8x1xf32>
    %55 = arith.addf %50, %54 : vector<8x1xf32>
    %c0_30 = arith.constant 0 : index
    %c0_31 = arith.constant 0 : index
    %56 = vector.load %arg6[%c0_30, %c0_31] : memref<8x1xf32, #tpu.memory_space<vmem>>, vector<8x1xf32>
    tpu.vector_store %arg6[%c0_30, %c0_31], %55 {strides = array<i32>} : memref<8x1xf32, #tpu.memory_space<vmem>>, vector<8x1xf32>,
    %c0_32 = arith.constant 0 : index
    %c0_33 = arith.constant 0 : index
    %57 = vector.load %arg7[%c0_32, %c0_33] : memref<8x1xf32, #tpu.memory_space<vmem>>, vector<8x1xf32>
    %58 = arith.subf %34, %4 : vector<8x128xf32>
    %59 = arith.mulf %58, %58 : vector<8x128xf32>
    %cst_34 = arith.constant dense<0.000000e+00> : vector<8xf32>
    %60 = vector.multi_reduction <add>, %59, %cst_34 [1] : vector<8x128xf32> to vector<8xf32>
    %61 = vector.shape_cast %60 : vector<8xf32> to vector<8x1xf32>
    %62 = arith.addf %57, %61 : vector<8x1xf32>
    %c0_35 = arith.constant 0 : index
    %c0_36 = arith.constant 0 : index
    %63 = vector.load %arg7[%c0_35, %c0_36] : memref<8x1xf32, #tpu.memory_space<vmem>>, vector<8x1xf32>
    tpu.vector_store %arg7[%c0_35, %c0_36], %62 {strides = array<i32>} : memref<8x1xf32, #tpu.memory_space<vmem>>, vector<8x1xf32>,
    %c0_i32_37 = arith.constant 0 : i32
    %64 = arith.cmpi eq, %arg0, %c0_i32_37 : i32
    %65 = arith.extui %64 : i1 to i32
    %c0_i32_38 = arith.constant 0 : i32
    %66 = arith.cmpi ne, %65, %c0_i32_38 : i32
    scf.if %66 {
      %c0_39 = arith.constant 0 : index
      %c0_40 = arith.constant 0 : index
      %67 = vector.load %arg8[%c0_39, %c0_40] : memref<1x1xf32, #tpu.memory_space<vmem>>, vector<1x1xf32>
      %cst_41 = arith.constant 3.200000e+01 : f32
      %68 = vector.broadcast %cst_41 : f32 to vector<1x1xf32>
      %69 = arith.mulf %68, %67 : vector<1x1xf32>
      %c0_42 = arith.constant 0 : index
      %c0_43 = arith.constant 0 : index
      %70 = vector.load %arg9[%c0_42, %c0_43] : memref<1x1xf32, #tpu.memory_space<vmem>>, vector<1x1xf32>
      %cst_44 = arith.constant 2.000000e+00 : f32
      %71 = vector.broadcast %cst_44 : f32 to vector<1x1xf32>
      %72 = arith.mulf %71, %70 : vector<1x1xf32>
      %73 = arith.subf %69, %72 : vector<1x1xf32>
      %cst_45 = arith.constant 0.000000e+00 : f32
      %74 = vector.broadcast %cst_45 : f32 to vector<1x1xf32>
      %75 = arith.maximumf %73, %74 : vector<1x1xf32>
      %cst_46 = arith.constant 2.400000e+02 : f32
      %76 = vector.broadcast %cst_46 : f32 to vector<1x1xf32>
      %77 = arith.divf %75, %76 : vector<1x1xf32>
      %cst_47 = arith.constant 4.000000e+00 : f32
      %78 = vector.broadcast %cst_47 : f32 to vector<1x1xf32>
      %79 = arith.divf %77, %78 : vector<1x1xf32>
      %cst_48 = arith.constant 1.600000e+01 : f32
      %80 = vector.broadcast %cst_48 : f32 to vector<1x1xf32>
      %81 = arith.mulf %79, %80 : vector<1x1xf32>
      %cst_49 = arith.constant -1.000000e+00 : f32
      %82 = vector.broadcast %cst_49 : f32 to vector<1x1xf32>
      %83 = arith.divf %82, %81 : vector<1x1xf32>
      %c0_50 = arith.constant 0 : index
      %c0_51 = arith.constant 0 : index
      %84 = vector.load %arg4[%c0_50, %c0_51] : memref<8x1xf32, #tpu.memory_space<vmem>>, vector<8x1xf32>
      %85 = vector.broadcast %83 : vector<1x1xf32> to vector<8x1xf32>
      %86 = arith.mulf %84, %85 : vector<8x1xf32>
      %87 = math.exp %86 : vector<8x1xf32>
      %88 = arith.mulf %87, %87 : vector<8x1xf32>
      %89 = arith.mulf %88, %88 : vector<8x1xf32>
      %90 = arith.mulf %89, %89 : vector<8x1xf32>
      %91 = arith.mulf %90, %90 : vector<8x1xf32>
      %92 = arith.addf %87, %88 : vector<8x1xf32>
      %93 = arith.addf %92, %89 : vector<8x1xf32>
      %94 = arith.addf %93, %90 : vector<8x1xf32>
      %95 = arith.addf %94, %91 : vector<8x1xf32>
      %c0_52 = arith.constant 0 : index
      %c0_53 = arith.constant 0 : index
      %96 = vector.load %arg5[%c0_52, %c0_53] : memref<8x1xf32, #tpu.memory_space<vmem>>, vector<8x1xf32>
      %97 = vector.broadcast %83 : vector<1x1xf32> to vector<8x1xf32>
      %98 = arith.mulf %96, %97 : vector<8x1xf32>
      %99 = math.exp %98 : vector<8x1xf32>
      %100 = arith.mulf %99, %99 : vector<8x1xf32>
      %101 = arith.mulf %100, %100 : vector<8x1xf32>
      %102 = arith.mulf %101, %101 : vector<8x1xf32>
      %103 = arith.mulf %102, %102 : vector<8x1xf32>
      %104 = arith.addf %99, %100 : vector<8x1xf32>
      %105 = arith.addf %104, %101 : vector<8x1xf32>
      %106 = arith.addf %105, %102 : vector<8x1xf32>
      %107 = arith.addf %106, %103 : vector<8x1xf32>
      %108 = arith.addf %95, %107 : vector<8x1xf32>
      %c0_54 = arith.constant 0 : index
      %c0_55 = arith.constant 0 : index
      %109 = vector.load %arg6[%c0_54, %c0_55] : memref<8x1xf32, #tpu.memory_space<vmem>>, vector<8x1xf32>
      %110 = vector.broadcast %83 : vector<1x1xf32> to vector<8x1xf32>
      %111 = arith.mulf %109, %110 : vector<8x1xf32>
      %112 = math.exp %111 : vector<8x1xf32>
      %113 = arith.mulf %112, %112 : vector<8x1xf32>
      %114 = arith.mulf %113, %113 : vector<8x1xf32>
      %115 = arith.mulf %114, %114 : vector<8x1xf32>
      %116 = arith.mulf %115, %115 : vector<8x1xf32>
      %117 = arith.addf %112, %113 : vector<8x1xf32>
      %118 = arith.addf %117, %114 : vector<8x1xf32>
      %119 = arith.addf %118, %115 : vector<8x1xf32>
      %120 = arith.addf %119, %116 : vector<8x1xf32>
      %121 = arith.subf %108, %120 : vector<8x1xf32>
      %c0_56 = arith.constant 0 : index
      %c0_57 = arith.constant 0 : index
      %122 = vector.load %arg7[%c0_56, %c0_57] : memref<8x1xf32, #tpu.memory_space<vmem>>, vector<8x1xf32>
      %123 = vector.broadcast %83 : vector<1x1xf32> to vector<8x1xf32>
      %124 = arith.mulf %122, %123 : vector<8x1xf32>
      %125 = math.exp %124 : vector<8x1xf32>
      %126 = arith.mulf %125, %125 : vector<8x1xf32>
      %127 = arith.mulf %126, %126 : vector<8x1xf32>
      %128 = arith.mulf %127, %127 : vector<8x1xf32>
      %129 = arith.mulf %128, %128 : vector<8x1xf32>
      %130 = arith.addf %125, %126 : vector<8x1xf32>
      %131 = arith.addf %130, %127 : vector<8x1xf32>
      %132 = arith.addf %131, %128 : vector<8x1xf32>
      %133 = arith.addf %132, %129 : vector<8x1xf32>
      %134 = arith.subf %121, %133 : vector<8x1xf32>
      %135 = vector.shape_cast %134 : vector<8x1xf32> to vector<1x8x1xf32>
      %cst_58 = arith.constant dense<0.000000e+00> : vector<1xf32>
      %136 = vector.multi_reduction <add>, %135, %cst_58 [1, 2] : vector<1x8x1xf32> to vector<1xf32>
      %137 = vector.shape_cast %136 : vector<1xf32> to vector<1x1x1xf32>
      %138 = vector.extract %137[0, 0, 0] : f32 from vector<1x1x1xf32>
      %cst_59 = arith.constant 8.000000e+00 : f32
      %139 = arith.divf %138, %cst_59 : f32
      %c0_60 = arith.constant 0 : index
      %c0_61 = arith.constant 0 : index
      %140 = memref.load %arg3[%c0_60, %c0_61] : memref<1x1xf32, #tpu.memory_space<smem>>
      memref.store %139, %arg3[%c0_60, %c0_61] : memref<1x1xf32, #tpu.memory_space<smem>>
    } else {
    }
    return
  }
  func.func @transform_0(%arg0: i32) -> (i32, i32) {
    %c0_i32 = arith.constant 0 : i32
    %c0_i32_0 = arith.constant 0 : i32
    return %c0_i32, %arg0 : i32, i32
  }
  func.func @transform_1(%arg0: i32) -> (i32, i32) {
    %c0_i32 = arith.constant 0 : i32
    %c0_i32_0 = arith.constant 0 : i32
    return %c0_i32, %arg0 : i32, i32
  }
  func.func @transform_2(%arg0: i32) -> (i32, i32) {
    %c0_i32 = arith.constant 0 : i32
    %c0_i32_0 = arith.constant 0 : i32
    %c0_i32_1 = arith.constant 0 : i32
    return %c0_i32, %c0_i32_0 : i32, i32
  }
}

</mosaic_0001>

<bundles_post_ra>
// kernel: tpu_custom_call.1
= control target key start
LH: loop header
LB: loop body
LE: loop exit
PB: predicated region body
PF: predicated region fallthrough
CT: control target
= control target key end

     0   :  { %7 = vsyncpa [#allocation9], 0  ;;  %s356_s0 = inlined_call_operand.hbm [shape: f32[8,128], index: 0, kind: input, shape index: {}]   ;;  %s357_s1 = inlined_call_operand.hbm [shape: f32[8,128], index: 1, kind: input, shape index: {}]   ;;  %s358_s2 = inlined_call_operand.hbm [shape: f32[1,1], index: 2, kind: output, shape index: {}]  }
   0x1   :  { %8 = vsyncpa [#allocation12], 0 }
   0x2   :  { %9 = vsyncpa [#allocation10], 0  ;;  %s315_s9 = smov [#allocation8]   ;;  %s316_s11 = smov [#allocation11]  }
   0x3   :  { %s16_s10 = sshll.u32 %s315_s9, 4  ;;  %s26_s12 = sshll.u32 %s316_s11, 4  ;;  %s17_s10 = int_to_ptr.vmem [resolvable:$true] %s16_s10  ;;  %s27_s12 = int_to_ptr.vmem [resolvable:$true] %s26_s12 }
   0x4   :  { %s269_s13 = scalar_lea.vmem %s17_s10, 128  ;;  %p274_p1 = scmp.lt.s32.totalorder %s17_s10, %s17_s10 }
   0x5   :  { %p270_p0 = scmp.ne.s32.totalorder %s17_s10, %s269_s13  ;;  %p275_p2 = scmp.lt.s32.totalorder %s269_s13, %s269_s13 }
   0x7   :  { %p276_p3 = por %p275_p2, %p274_p1 }
   0x9   :  { %p277_p4 = pnand %p276_p3, %p270_p0 }
   0xb   :  { %280 = shalt.err (!%p277_p4)
}
   0xc   :  { %19 = dma.hbm_to_vmem [thread:$0]  %s356_s0, 128, %s17_s10, [#allocation9]  }
   0xd   :  { %s289_s16 = scalar_lea.vmem %s27_s12, 128  ;;  %p294_p6 = scmp.lt.s32.totalorder %s27_s12, %s27_s12 }
   0xe   :  { %p290_p5 = scmp.ne.s32.totalorder %s27_s12, %s289_s16  ;;  %p295_p7 = scmp.lt.s32.totalorder %s289_s16, %s289_s16 }
  0x10   :  { %p296_p8 = por %p295_p7, %p294_p6 }
  0x12   :  { %p297_p9 = pnand %p296_p8, %p290_p5 }
  0x14   :  { %300 = shalt.err (!%p297_p9)
}
  0x15   :  { %29 = dma.hbm_to_vmem [thread:$0]  %s357_s1, 128, %s27_s12, [#allocation12]  }
  0x16   :  { %309 = dma.done.wait [#allocation9], 128  }
  0x17   :  { %310 = vsyncadd [#allocation9], 4294967168 }
  0x18   :  { %311 = dma.done.wait [#allocation12], 128  }
  0x19   :  { %312 = vsyncadd [#allocation12], 4294967168  ;;  %v48_v0 = vld [vmem:[#allocation8] sm:$0xff]  ;;  %v49_v1 = vld [vmem:[#allocation11] sm:$0xff]  ;;  %vm91_vm0 = vcmask 1040384   ;;  %vm45_vm1 = vcmask 0  }
  0x1a   :  { %v51_v2 = vmul.f32 %v48_v0, %v48_v0  ;;  %v76_v3 = vrot.slane %v48_v0, 4  ;;  %v82_v4 = vrot.slane %v49_v1, 4  ;;  %v106_v5 = vrot.slane %v49_v1, 1  ;;  %s318_s23 = smov [#allocation13]  }
  0x1b   :  { %v61_v6 = vmul.f32 %v49_v1, %v49_v1  ;;  %v105_v12 = vrot.slane %v48_v0, 1  ;;  %v317_v29 = vmov 0.0   ;;  %vm40_vm2 = vcmask 7168  }
  0x1c   :  { %52 = vadd.xlane.f32.xlu0 %v51_v2  ;;  %v77_v7 = vadd.f32 %v76_v3, %v48_v0  ;;  %v83_v8 = vadd.f32 %v82_v4, %v49_v1  ;;  %v116_v9 = vsub.f32 %v49_v1, %v106_v5  ;;  %v123_v27 = vsub.f32 %v48_v0, %v106_v5 }
  0x1d   :  { %v130_v16 = vsub.f32 %v105_v12, %v49_v1  ;;  %v108_v23 = vsub.f32 %v48_v0, %v105_v12  ;;  %46 = vst.msk [vmem:[#allocation6] sm:$0x1] %vm45_vm1, %v317_v29  ;;  %47 = vst.msk [vmem:[#allocation7] sm:$0x1] %vm45_vm1, %v317_v29 }
  0x1e   :  { %v78_v10 = vrot.slane %v77_v7, 2  ;;  %v84_v11 = vrot.slane %v83_v8, 2  ;;  %v117_v15 = vmul.f32 %v116_v9, %v116_v9  ;;  %v124_v28 = vmul.f32 %v123_v27, %v123_v27  ;;  %41 = vst.msk [vmem:[#allocation2] sm:$0xff] %vm40_vm2, %v317_v29  ;;  %42 = vst.msk [vmem:[#allocation3] sm:$0xff] %vm40_vm2, %v317_v29 }
  0x1f   :  { %v131_v21 = vmul.f32 %v130_v16, %v130_v16  ;;  %v109_v26 = vmul.f32 %v108_v23, %v108_v23  ;;  %43 = vst.msk [vmem:[#allocation4] sm:$0xff] %vm40_vm2, %v317_v29  ;;  %44 = vst.msk [vmem:[#allocation5] sm:$0xff] %vm40_vm2, %v317_v29 }
  0x20   :  { %62 = vadd.xlane.f32.xlu0 %v61_v6  ;;  %v79_v13 = vadd.f32 %v78_v10, %v77_v7  ;;  %v85_v14 = vadd.f32 %v84_v11, %v83_v8 }
  0x22   :  { %v80_v17 = vrot.slane %v79_v13, 1  ;;  %v86_v18 = vrot.slane %v85_v14, 1 }
  0x24   :  { %v81_v19 = vadd.f32 %v80_v17, %v79_v13  ;;  %v87_v20 = vadd.f32 %v86_v18, %v85_v14  ;;  %118 = vadd.xlane.f32.xlu0 %v117_v15  ;;  %v50_v63 = vld [vmem:[#allocation6] sm:$0x1]  ;;  %v89_v2 = vld [vmem:[#allocation7] sm:$0x1]  ;;  %v154_v14 = vlaneseq }
  0x25   :  { %v115_v36 = vld [vmem:[#allocation3] sm:$0xff]  ;;  %v107_v52 = vld [vmem:[#allocation2] sm:$0xff] }
  0x26   :  { %v88_v22 = vadd.f32 %v87_v20, %v81_v19  ;;  %v129_v43 = vld [vmem:[#allocation5] sm:$0xff]  ;;  %v122_v57 = vld [vmem:[#allocation4] sm:$0xff]  ;;  %v155_v15 = vshrl.u32 %v154_v14, 7 }
  0x28   :  { %v90_v24 = vmul.f32 %v88_v22, %v88_v22  ;;  %132 = vadd.xlane.f32.xlu0 %v131_v21  ;;  %v156_v16 = vsub.s32 0, %v155_v15 }
  0x2a   :  { %v92_v25 = vsel %vm91_vm0, %v90_v24, 0.0 }
  0x2b   :  { %93 = vadd.xlane.f32.xlu1 %v92_v25 }
  0x2f   :  { %110 = vadd.xlane.f32.xlu1 %v109_v26 }
  0x33   :  { %125 = vadd.xlane.f32.xlu1 %v124_v28 }
  0xa5   :  { %v53_v30 = vpop.xlane.xlu0 %52 }
  0xa6   :  { %v54_v31 = vrot.slane %v53_v30, 4 }
  0xa8   :  { %v55_v32 = vadd.f32 %v54_v31, %v53_v30 }
  0xa9   :  { %v63_v33 = vpop.xlane.xlu0 %62 }
  0xaa   :  { %v56_v34 = vrot.slane %v55_v32, 2  ;;  %v64_v35 = vrot.slane %v63_v33, 4 }
  0xac   :  { %v65_v37 = vadd.f32 %v64_v35, %v63_v33  ;;  %v57_v38 = vadd.f32 %v56_v34, %v55_v32 }
  0xad   :  { %v119_v39 = vpop.xlane.xlu0 %118 }
  0xae   :  { %v66_v40 = vrot.slane %v65_v37, 2  ;;  %v58_v41 = vrot.slane %v57_v38, 1  ;;  %v120_v42 = vadd.f32 %v119_v39, %v115_v36 }
  0xb0   :  { %v59_v44 = vadd.f32 %v58_v41, %v57_v38  ;;  %v67_v45 = vadd.f32 %v66_v40, %v65_v37  ;;  %121 = vst.msk [vmem:[#allocation3] sm:$0xff] %vm40_vm2, %v120_v42 }
  0xb1   :  { %v133_v46 = vpop.xlane.xlu0 %132 }
  0xb2   :  { %239 = vpush %v59_v44  ;;  %v68_v47 = vrot.slane %v67_v45, 1  ;;  %v134_v48 = vadd.f32 %v133_v46, %v129_v43 }
  0xb4   :  { %v94_v49 = vpop.xlane.xlu1 %93  ;;  %v69_v50 = vadd.f32 %v68_v47, %v67_v45  ;;  %135 = vst.msk [vmem:[#allocation5] sm:$0xff] %vm40_vm2, %v134_v48 }
  0xb5   :  { %v95_v51 = vrot.slane %v94_v49, 4 }
  0xb6   :  { %241 = vpush %v69_v50 }
  0xb7   :  { %v96_v53 = vadd.f32 %v95_v51, %v94_v49  ;;  %v170_v19 = vld [vmem:[#allocation3] sm:$0xff] }
  0xb8   :  { %v111_v54 = vpop.xlane.xlu1 %110 }
  0xb9   :  { %v97_v55 = vrot.slane %v96_v53, 2  ;;  %v112_v56 = vadd.f32 %v111_v54, %v107_v52 }
  0xbb   :  { %v98_v58 = vadd.f32 %v97_v55, %v96_v53  ;;  %114 = vst.msk [vmem:[#allocation2] sm:$0xff] %vm40_vm2, %v112_v56  ;;  %v196_v21 = vld [vmem:[#allocation5] sm:$0xff] }
  0xbc   :  { %v126_v59 = vpop.xlane.xlu1 %125 }
  0xbd   :  { %v99_v60 = vrot.slane %v98_v58, 1  ;;  %v127_v61 = vadd.f32 %v126_v59, %v122_v57 }
  0xbf   :  { %v100_v62 = vadd.f32 %v99_v60, %v98_v58  ;;  %128 = vst.msk [vmem:[#allocation4] sm:$0xff] %vm40_vm2, %v127_v61 }
  0xc1   :  { %243 = vpush %v100_v62 }
  0xc2   :  { %v152_v23 = vld [vmem:[#allocation2] sm:$0xff] }
  0xc6   :  { %v183_v20 = vld [vmem:[#allocation4] sm:$0xff] }
  0xe3   :  { %s240_s0 = spop %239 }
  0xe7   :  { %s242_s1 = spop %241 }
  0xe8   :  { %s71_s19 = sadd.f32 %s242_s1, %s240_s0 }
  0xea   :  { %v72_v0 = vstv %s71_s19 }
  0xeb   :  { %v73_v1 = vadd.f32 %v72_v0, %v50_v63 }
  0xed   :  { %75 = vst.msk [vmem:[#allocation6] sm:$0x1] %vm45_vm1, %v73_v1 }
  0xf2   :  { %s244_s20 = spop %243 }
  0xf3   :  { %v102_v3 = vstv %s244_s20 }
  0xf4   :  { %v103_v4 = vadd.f32 %v102_v3, %v89_v2  ;;  %v139_v5 = vld [vmem:[#allocation6] sm:$0x1] }
  0xf5   :  { %v140_v7 = vmul.f32 32.0, %v139_v5 }
  0xf6   :  { %104 = vst.msk [vmem:[#allocation7] sm:$0x1] %vm45_vm1, %v103_v4 }
  0xfd   :  { %v141_v6 = vld [vmem:[#allocation7] sm:$0x1] }
  0xfe   :  { %v142_v8 = vmul.f32 2.0, %v141_v6 }
 0x100   :  { %v143_v9 = vsub.f32 %v140_v7, %v142_v8 }
 0x102   :  { %v144_v10 = vmax.f32 %v143_v9, 0.0 }
 0x104   :  { %v146_v11 = vmul.f32 0.004166667, %v144_v10 }
 0x106   :  { %v148_v12 = vmul.f32 0.25, %v146_v11 }
 0x108   :  { %v149_v13 = vmul.f32 16.0, %v148_v12 }
 0x10a   :  { %251 = vrcp.f32 %v149_v13 }
 0x117   :  { %v252_v17 = vpop.eup %251 }
 0x118   :  { %v151_v18 = vmul.f32 -1.0, %v252_v17 }
 0x11a   :  { %v157_v22 = vrot.slane %v151_v18, %v156_v16 }
 0x11c   :  { %v159_v24 = vmul.f32 %v157_v22, %v152_v23  ;;  %v171_v25 = vmul.f32 %v170_v19, %v157_v22  ;;  %v184_v26 = vmul.f32 %v183_v20, %v157_v22  ;;  %v197_v27 = vmul.f32 %v196_v21, %v157_v22 }
 0x11e   :  { %v160_v28 = vmul.f32 1.442695, %v159_v24  ;;  %v172_v29 = vmul.f32 1.442695, %v171_v25  ;;  %v185_v30 = vmul.f32 1.442695, %v184_v26 }
 0x11f   :  { %v198_v31 = vmul.f32 1.442695, %v197_v27 }
 0x120   :  { %253 = vpow2.f32 %v160_v28 }
 0x121   :  { %255 = vpow2.f32 %v172_v29 }
 0x122   :  { %257 = vpow2.f32 %v185_v30 }
 0x123   :  { %259 = vpow2.f32 %v198_v31 }
 0x12d   :  { %v254_v32 = vpop.eup %253 }
 0x12e   :  { %v256_v33 = vpop.eup %255  ;;  %v162_v34 = vmul.f32 %v254_v32, %v254_v32 }
 0x12f   :  { %v258_v35 = vpop.eup %257  ;;  %v174_v36 = vmul.f32 %v256_v33, %v256_v33 }
 0x130   :  { %v260_v37 = vpop.eup %259  ;;  %v163_v38 = vmul.f32 %v162_v34, %v162_v34  ;;  %v166_v39 = vadd.f32 %v254_v32, %v162_v34  ;;  %v187_v40 = vmul.f32 %v258_v35, %v258_v35 }
 0x131   :  { %v175_v41 = vmul.f32 %v174_v36, %v174_v36  ;;  %v178_v42 = vadd.f32 %v256_v33, %v174_v36  ;;  %v200_v43 = vmul.f32 %v260_v37, %v260_v37 }
 0x132   :  { %v164_v44 = vmul.f32 %v163_v38, %v163_v38  ;;  %v167_v45 = vadd.f32 %v166_v39, %v163_v38  ;;  %v188_v46 = vmul.f32 %v187_v40, %v187_v40  ;;  %v191_v47 = vadd.f32 %v258_v35, %v187_v40 }
 0x133   :  { %v176_v48 = vmul.f32 %v175_v41, %v175_v41  ;;  %v179_v49 = vadd.f32 %v178_v42, %v175_v41  ;;  %v201_v50 = vmul.f32 %v200_v43, %v200_v43  ;;  %v204_v51 = vadd.f32 %v260_v37, %v200_v43 }
 0x134   :  { %v165_v52 = vmul.f32 %v164_v44, %v164_v44  ;;  %v168_v53 = vadd.f32 %v167_v45, %v164_v44  ;;  %v189_v54 = vmul.f32 %v188_v46, %v188_v46  ;;  %v192_v55 = vadd.f32 %v191_v47, %v188_v46 }
 0x135   :  { %v177_v56 = vmul.f32 %v176_v48, %v176_v48  ;;  %v180_v57 = vadd.f32 %v179_v49, %v176_v48  ;;  %v202_v58 = vmul.f32 %v201_v50, %v201_v50  ;;  %v205_v59 = vadd.f32 %v204_v51, %v201_v50 }
 0x136   :  { %v169_v60 = vadd.f32 %v168_v53, %v165_v52  ;;  %v190_v61 = vmul.f32 %v189_v54, %v189_v54  ;;  %v193_v62 = vadd.f32 %v192_v55, %v189_v54 }
 0x137   :  { %v181_v63 = vadd.f32 %v180_v57, %v177_v56  ;;  %v203_v0 = vmul.f32 %v202_v58, %v202_v58  ;;  %v206_v1 = vadd.f32 %v205_v59, %v202_v58 }
 0x138   :  { %v194_v3 = vadd.f32 %v193_v62, %v190_v61 }
 0x139   :  { %v182_v2 = vadd.f32 %v181_v63, %v169_v60  ;;  %v207_v5 = vadd.f32 %v206_v1, %v203_v0 }
 0x13b   :  { %v195_v4 = vsub.f32 %v182_v2, %v194_v3 }
 0x13d   :  { %v208_v6 = vsub.f32 %v195_v4, %v207_v5 }
 0x13f   :  { %v209_v7 = vsel %vm40_vm2, %v208_v6, 0.0 }
 0x140   :  { %210 = vadd.xlane.f32.xlu1 %v209_v7 }
 0x1c9   :  { %v211_v8 = vpop.xlane.xlu1 %210 }
 0x1ca   :  { %v212_v9 = vrot.slane %v211_v8, 4 }
 0x1cc   :  { %v213_v10 = vadd.f32 %v212_v9, %v211_v8 }
 0x1ce   :  { %v214_v11 = vrot.slane %v213_v10, 2 }
 0x1d0   :  { %v215_v12 = vadd.f32 %v214_v11, %v213_v10 }
 0x1d2   :  { %v216_v13 = vrot.slane %v215_v12, 1 }
 0x1d4   :  { %v217_v14 = vadd.f32 %v216_v13, %v215_v12 }
 0x1d6   :  { %245 = vpush %v217_v14 }
 0x207   :  { %s246_s21 = spop %245 }
 0x208   :  { %s221_s22 = smul.f32 0.125, %s246_s21 }
 0x20a   :  { %223 = sst [smem:[#allocation13]] %s221_s22 }
 0x20b   :  { %231 = dma.smem_to_hbm %s318_s23, 16, %s358_s2, [#allocation10]  }
 0x20c   :  { %313 = dma.done.wait [#allocation10], 16  }
 0x20d   :  { %314 = vsyncadd [#allocation10], 4294967280 }
 0x20e   :  { %235 = sfence }
 0x20f   :  { %236 = vsyncpa [#allocation9], 1 }
 0x210   :  { %237 = vsyncpa [#allocation12], 1 }
 0x211   :  { %238 = vsyncpa [#allocation10], 1 }

</bundles_post_ra>
